<compile_context>
chip_gen: v7x
topology: tpu7x:2x2x1
jax: 0.10.0
libtpu: 0.0.40
codegen_flags: <defaults>
</compile_context>

<pallas_src>
import functools

import jax
import jax.numpy as jnp
import numpy as np
from jax.experimental import pallas as pl
from jax.experimental.pallas import tpu as pltpu


def _decoder_block_kernel(x2d_ref, wband_ref, g_ref, gt_ref, gamma_ref, beta_ref,
                          o_ref, *, n_batch, h_out, hp_pad):
    """Fused conv3x3 (one banded matmul) + BatchNorm2d (batch stats) + ReLU.

    x2d_ref   : (N*Hp, Wp*Cin)      zero-padded NHWC input, rows=(n,h'), cols=(w',ci)
    wband_ref : (3*Wp*Cin, W*Cout)  banded conv weight (all 9 taps in one matmul)
    g_ref     : (W*Cout, Cout)      0/1 gather matrix: per-channel lane-group reduce
    gt_ref    : (Cout, W*Cout)      0/1 scatter matrix: per-channel lane broadcast
    gamma_ref : (1, Cout)           BN weight
    beta_ref  : (1, Cout)           BN bias
    o_ref     : (N*H, W*Cout)       lane-dense output, rows=(n,h), cols=(w,co)
    """
    # --- build the im2row LHS: static slices + concatenations only -------------
    rows = []
    for n in range(n_batch):
        base = n * hp_pad
        taps = [x2d_ref[base + kh: base + kh + h_out, :] for kh in range(3)]
        rows.append(jnp.concatenate(taps, axis=1))                 # (H, 3*Wp*Cin)
    lhs = jnp.concatenate(rows, axis=0) if n_batch > 1 else rows[0]  # (N*H, 3*Wp*Cin)

    # --- conv3x3: single MXU matmul into a lane-dense accumulator ---------------
    acc = jnp.dot(lhs, wband_ref[...], preferred_element_type=jnp.float32)  # (N*H, W*Cout)
    # conv bias intentionally omitted: per-channel constants cancel in BN's (x - mean).

    # --- BatchNorm2d (training-mode batch stats), folded affine -----------------
    w_out = o_ref.shape[1] // gamma_ref.shape[1]
    cnt = float(acc.shape[0] * w_out)                              # N*H*W
    s1 = jnp.sum(acc, axis=0, keepdims=True)                       # (1, W*Cout)
    s2 = jnp.sum(acc * acc, axis=0, keepdims=True)                 # (1, W*Cout)
    csum = jnp.dot(s1, g_ref[...], preferred_element_type=jnp.float32)   # (1, Cout)
    csqs = jnp.dot(s2, g_ref[...], preferred_element_type=jnp.float32)   # (1, Cout)
    mean = csum / cnt
    var = jnp.maximum(csqs / cnt - mean * mean, 0.0)
    inv_std = jax.lax.rsqrt(var + 1e-5)
    scale = gamma_ref[...] * inv_std                               # (1, Cout)
    shift = beta_ref[...] - mean * scale                           # (1, Cout)
    # broadcast per-channel constants into the (w, co)-interleaved lane layout via MXU
    scale_l = jnp.dot(scale, gt_ref[...], preferred_element_type=jnp.float32)  # (1, W*Cout)
    shift_l = jnp.dot(shift, gt_ref[...], preferred_element_type=jnp.float32)  # (1, W*Cout)

    # --- fused BN affine + ReLU, unmasked lane-dense store ----------------------
    o_ref[...] = jnp.maximum(acc * scale_l + shift_l, 0.0)


@jax.jit
def decoder_block_forward(x_nchw, w_hwio, b, gamma, beta):
    """x: (N, Cin, H, W) f32, w_hwio: (3, 3, Cin, Cout) -> (N, Cout, H, W) f32."""
    N, Cin, H, W = x_nchw.shape
    Cout = w_hwio.shape[-1]
    Hp, Wp = H + 2, W + 2

    # conv bias is a per-channel constant -> exactly cancelled by training-mode BN.
    del b

    # NCHW -> NHWC + zero pad (pad=1); tiny tensors here, XLA fuses these passes.
    xp = jnp.pad(jnp.transpose(x_nchw, (0, 2, 3, 1)),
                 ((0, 0), (1, 1), (1, 1), (0, 0)))
    x2d = xp.reshape(N * Hp, Wp * Cin)                             # contiguous, free

    # Banded "im2row" weight: wband[(kh, w', ci), (w, co)] = Wc[kh, w'-w, ci, co]
    # for 0 <= w'-w <= 2 else 0  ->  all 9 taps collapse into ONE matmul in the kernel.
    sel = np.zeros((3, Wp, W), np.float32)
    for kw in range(3):
        sel[kw, kw + np.arange(W), np.arange(W)] = 1.0
    wband = jnp.einsum('bpw,abio->apiwo', jnp.asarray(sel), w_hwio)
    wband = wband.reshape(3 * Wp * Cin, W * Cout)

    # 0/1 matrices for per-channel lane-group reduce / broadcast inside the kernel.
    g_mat = jnp.asarray(np.tile(np.eye(Cout, dtype=np.float32), (W, 1)))   # (W*Cout, Cout)
    gt_mat = jnp.asarray(np.tile(np.eye(Cout, dtype=np.float32), (1, W)))  # (Cout, W*Cout)

    kernel = functools.partial(_decoder_block_kernel, n_batch=N, h_out=H, hp_pad=Hp)

    out2d = pl.pallas_call(
        kernel,
        out_shape=jax.ShapeDtypeStruct((N * H, W * Cout), jnp.float32),
        grid_spec=pl.GridSpec(
            grid=(1,),  # whole (tiny) problem fits VMEM; BN needs global batch stats
            in_specs=[
                pl.BlockSpec((N * Hp, Wp * Cin), lambda i: (0, 0)),
                pl.BlockSpec((3 * Wp * Cin, W * Cout), lambda i: (0, 0)),
                pl.BlockSpec((W * Cout, Cout), lambda i: (0, 0)),
                pl.BlockSpec((Cout, W * Cout), lambda i: (0, 0)),
                pl.BlockSpec((1, Cout), lambda i: (0, 0)),
                pl.BlockSpec((1, Cout), lambda i: (0, 0)),
            ],
            out_specs=pl.BlockSpec((N * H, W * Cout), lambda i: (0, 0)),
        ),
        compiler_params=pltpu.CompilerParams(
            dimension_semantics=("arbitrary",)),
    )(x2d, wband, g_mat, gt_mat, gamma.reshape(1, Cout), beta.reshape(1, Cout))

    # (N*H, W*Cout) -> (N, H, W, Cout) (free) -> NCHW (small output transpose)
    return jnp.transpose(out2d.reshape(N, H, W, Cout), (0, 3, 1, 2))


def _reference(x_nchw, w_hwio, b, gamma, beta):
    """Pure-JAX reference of the same forward pass (for correctness check)."""
    x_nhwc = jnp.transpose(x_nchw, (0, 2, 3, 1))
    y = jax.lax.conv_general_dilated(
        x_nhwc, w_hwio, window_strides=(1, 1), padding="SAME",
        dimension_numbers=("NHWC", "HWIO", "NHWC"))
    y = y + b.reshape(1, 1, 1, -1)
    mean = jnp.mean(y, axis=(0, 1, 2), keepdims=True)
    var = jnp.mean((y - mean) ** 2, axis=(0, 1, 2), keepdims=True)
    y = (y - mean) * jax.lax.rsqrt(var + 1e-5)
    y = y * gamma.reshape(1, 1, 1, -1) + beta.reshape(1, 1, 1, -1)
    y = jnp.maximum(y, 0.0)
    return jnp.transpose(y, (0, 3, 1, 2))


if __name__ == "__main__":
    # Small shapes consistent with the module: DecoderBlock(in_channels=4, out_channels=8)
    N, Cin, Cout, H, W = 2, 4, 8, 16, 16

    key = jax.random.PRNGKey(0)
    kx, kw, kb, kg, kbt = jax.random.split(key, 5)

    x = jax.random.normal(kx, (N, Cin, H, W), jnp.float32)

    # Deterministic synthetic params (PyTorch layout would be OIHW -> we build HWIO directly).
    fan_in = Cin * 3 * 3
    bound = 1.0 / np.sqrt(fan_in)
    w_hwio = jax.random.uniform(kw, (3, 3, Cin, Cout), jnp.float32, -bound, bound)
    b = jax.random.uniform(kb, (Cout,), jnp.float32, -bound, bound)
    gamma = jnp.ones((Cout,), jnp.float32)   # BatchNorm2d default weight init
    beta = jnp.zeros((Cout,), jnp.float32)   # BatchNorm2d default bias init

    out = decoder_block_forward(x, w_hwio, b, gamma, beta)
    out = jax.block_until_ready(out)

    ref = jax.block_until_ready(_reference(x, w_hwio, b, gamma, beta))
    np.testing.assert_allclose(np.asarray(out), np.asarray(ref), rtol=1e-3, atol=1e-3)

    assert out.shape == (N, Cout, H, W)
    print("KERNEL_OK")
</pallas_src>

<mosaic_0001>
module attributes {stable_mosaic.version = 11 : i64} {
  func.func @_decoder_block_kernel(%arg0: i32, %arg1: memref<36x72xf32, #tpu.memory_space<vmem>>, %arg2: memref<216x128xf32, #tpu.memory_space<vmem>>, %arg3: memref<128x8xf32, #tpu.memory_space<vmem>>, %arg4: memref<8x128xf32, #tpu.memory_space<vmem>>, %arg5: memref<1x8xf32, #tpu.memory_space<vmem>>, %arg6: memref<1x8xf32, #tpu.memory_space<vmem>>, %arg7: memref<32x128xf32, #tpu.memory_space<vmem>>) attributes {dimension_semantics = [#tpu.dimension_semantics<arbitrary>], iteration_bounds = array<i64: 1>, scalar_prefetch = 0 : i64, scratch_operands = 0 : i64, tpu.core_type = #tpu.core_type<tc>, window_params = [{pipeline_mode = #tpu.pipeline_mode<synchronous>, transform_indices = @transform_0, window_bounds = array<i64: 36, 72>}, {pipeline_mode = #tpu.pipeline_mode<synchronous>, transform_indices = @transform_1, window_bounds = array<i64: 216, 128>}, {pipeline_mode = #tpu.pipeline_mode<synchronous>, transform_indices = @transform_2, window_bounds = array<i64: 128, 8>}, {pipeline_mode = #tpu.pipeline_mode<synchronous>, transform_indices = @transform_3, window_bounds = array<i64: 8, 128>}, {pipeline_mode = #tpu.pipeline_mode<synchronous>, transform_indices = @transform_4, window_bounds = array<i64: 1, 8>}, {pipeline_mode = #tpu.pipeline_mode<synchronous>, transform_indices = @transform_5, window_bounds = array<i64: 1, 8>}, {pipeline_mode = #tpu.pipeline_mode<synchronous>, transform_indices = @transform_6, window_bounds = array<i64: 32, 128>}]} {
    %c0 = arith.constant 0 : index
    %c0_0 = arith.constant 0 : index
    %0 = vector.load %arg1[%c0, %c0_0] : memref<36x72xf32, #tpu.memory_space<vmem>>, vector<16x72xf32>
    %c1 = arith.constant 1 : index
    %c0_1 = arith.constant 0 : index
    %1 = vector.load %arg1[%c1, %c0_1] : memref<36x72xf32, #tpu.memory_space<vmem>>, vector<16x72xf32>
    %c2 = arith.constant 2 : index
    %c0_2 = arith.constant 0 : index
    %2 = vector.load %arg1[%c2, %c0_2] : memref<36x72xf32, #tpu.memory_space<vmem>>, vector<16x72xf32>
    %3 = tpu.concatenate %0, %1, %2 in 1 : vector<16x72xf32>, vector<16x72xf32>, vector<16x72xf32> -> vector<16x216xf32>
    %c18 = arith.constant 18 : index
    %c0_3 = arith.constant 0 : index
    %4 = vector.load %arg1[%c18, %c0_3] : memref<36x72xf32, #tpu.memory_space<vmem>>, vector<16x72xf32>
    %c19 = arith.constant 19 : index
    %c0_4 = arith.constant 0 : index
    %5 = vector.load %arg1[%c19, %c0_4] : memref<36x72xf32, #tpu.memory_space<vmem>>, vector<16x72xf32>
    %c20 = arith.constant 20 : index
    %c0_5 = arith.constant 0 : index
    %6 = vector.load %arg1[%c20, %c0_5] : memref<36x72xf32, #tpu.memory_space<vmem>>, vector<16x72xf32>
    %7 = tpu.concatenate %4, %5, %6 in 1 : vector<16x72xf32>, vector<16x72xf32>, vector<16x72xf32> -> vector<16x216xf32>
    %8 = tpu.concatenate %3, %7 in 0 : vector<16x216xf32>, vector<16x216xf32> -> vector<32x216xf32>
    %c0_6 = arith.constant 0 : index
    %c0_7 = arith.constant 0 : index
    %9 = vector.load %arg2[%c0_6, %c0_7] : memref<216x128xf32, #tpu.memory_space<vmem>>, vector<216x128xf32>
    %cst = arith.constant dense<0.000000e+00> : vector<32x128xf32>
    %10 = tpu.matmul %8, %9, %cst {dimension_numbers = #tpu.dot_dimension_numbers<[1], [0], [0], [1], [0, 0, 1, 1], [], []>} : vector<32x216xf32>, vector<216x128xf32>, vector<32x128xf32> -> vector<32x128xf32>
    %cst_8 = arith.constant dense<0.000000e+00> : vector<128xf32>
    %11 = vector.multi_reduction <add>, %10, %cst_8 [0] : vector<32x128xf32> to vector<128xf32>
    %12 = vector.shape_cast %11 : vector<128xf32> to vector<1x128xf32>
    %13 = arith.mulf %10, %10 : vector<32x128xf32>
    %cst_9 = arith.constant dense<0.000000e+00> : vector<128xf32>
    %14 = vector.multi_reduction <add>, %13, %cst_9 [0] : vector<32x128xf32> to vector<128xf32>
    %15 = vector.shape_cast %14 : vector<128xf32> to vector<1x128xf32>
    %c0_10 = arith.constant 0 : index
    %c0_11 = arith.constant 0 : index
    %16 = vector.load %arg3[%c0_10, %c0_11] : memref<128x8xf32, #tpu.memory_space<vmem>>, vector<128x8xf32>
    %cst_12 = arith.constant dense<0.000000e+00> : vector<1x8xf32>
    %17 = tpu.matmul %12, %16, %cst_12 {dimension_numbers = #tpu.dot_dimension_numbers<[1], [0], [0], [1], [0, 0, 1, 1], [], []>} : vector<1x128xf32>, vector<128x8xf32>, vector<1x8xf32> -> vector<1x8xf32>
    %c0_13 = arith.constant 0 : index
    %c0_14 = arith.constant 0 : index
    %18 = vector.load %arg3[%c0_13, %c0_14] : memref<128x8xf32, #tpu.memory_space<vmem>>, vector<128x8xf32>
    %cst_15 = arith.constant dense<0.000000e+00> : vector<1x8xf32>
    %19 = tpu.matmul %15, %18, %cst_15 {dimension_numbers = #tpu.dot_dimension_numbers<[1], [0], [0], [1], [0, 0, 1, 1], [], []>} : vector<1x128xf32>, vector<128x8xf32>, vector<1x8xf32> -> vector<1x8xf32>
    %cst_16 = arith.constant 5.120000e+02 : f32
    %20 = vector.broadcast %cst_16 : f32 to vector<1x8xf32>
    %21 = arith.divf %17, %20 : vector<1x8xf32>
    %cst_17 = arith.constant 5.120000e+02 : f32
    %22 = vector.broadcast %cst_17 : f32 to vector<1x8xf32>
    %23 = arith.divf %19, %22 : vector<1x8xf32>
    %24 = arith.mulf %21, %21 : vector<1x8xf32>
    %25 = arith.subf %23, %24 : vector<1x8xf32>
    %cst_18 = arith.constant 0.000000e+00 : f32
    %26 = vector.broadcast %cst_18 : f32 to vector<1x8xf32>
    %27 = arith.maximumf %25, %26 : vector<1x8xf32>
    %cst_19 = arith.constant 9.99999974E-6 : f32
    %28 = vector.broadcast %cst_19 : f32 to vector<1x8xf32>
    %29 = arith.addf %27, %28 : vector<1x8xf32>
    %30 = math.rsqrt %29 : vector<1x8xf32>
    %c0_20 = arith.constant 0 : index
    %c0_21 = arith.constant 0 : index
    %31 = vector.load %arg5[%c0_20, %c0_21] : memref<1x8xf32, #tpu.memory_space<vmem>>, vector<1x8xf32>
    %32 = arith.mulf %31, %30 : vector<1x8xf32>
    %c0_22 = arith.constant 0 : index
    %c0_23 = arith.constant 0 : index
    %33 = vector.load %arg6[%c0_22, %c0_23] : memref<1x8xf32, #tpu.memory_space<vmem>>, vector<1x8xf32>
    %34 = arith.mulf %21, %32 : vector<1x8xf32>
    %35 = arith.subf %33, %34 : vector<1x8xf32>
    %c0_24 = arith.constant 0 : index
    %c0_25 = arith.constant 0 : index
    %36 = vector.load %arg4[%c0_24, %c0_25] : memref<8x128xf32, #tpu.memory_space<vmem>>, vector<8x128xf32>
    %cst_26 = arith.constant dense<0.000000e+00> : vector<1x128xf32>
    %37 = tpu.matmul %32, %36, %cst_26 {dimension_numbers = #tpu.dot_dimension_numbers<[1], [0], [0], [1], [0, 0, 1, 1], [], []>} : vector<1x8xf32>, vector<8x128xf32>, vector<1x128xf32> -> vector<1x128xf32>
    %c0_27 = arith.constant 0 : index
    %c0_28 = arith.constant 0 : index
    %38 = vector.load %arg4[%c0_27, %c0_28] : memref<8x128xf32, #tpu.memory_space<vmem>>, vector<8x128xf32>
    %cst_29 = arith.constant dense<0.000000e+00> : vector<1x128xf32>
    %39 = tpu.matmul %35, %38, %cst_29 {dimension_numbers = #tpu.dot_dimension_numbers<[1], [0], [0], [1], [0, 0, 1, 1], [], []>} : vector<1x8xf32>, vector<8x128xf32>, vector<1x128xf32> -> vector<1x128xf32>
    %40 = vector.broadcast %37 : vector<1x128xf32> to vector<32x128xf32>
    %41 = arith.mulf %10, %40 : vector<32x128xf32>
    %42 = vector.broadcast %39 : vector<1x128xf32> to vector<32x128xf32>
    %43 = arith.addf %41, %42 : vector<32x128xf32>
    %cst_30 = arith.constant 0.000000e+00 : f32
    %44 = vector.broadcast %cst_30 : f32 to vector<32x128xf32>
    %45 = arith.maximumf %43, %44 : vector<32x128xf32>
    %c0_31 = arith.constant 0 : index
    %c0_32 = arith.constant 0 : index
    %46 = vector.load %arg7[%c0_31, %c0_32] : memref<32x128xf32, #tpu.memory_space<vmem>>, vector<32x128xf32>
    tpu.vector_store %arg7[%c0_31, %c0_32], %45 {strides = array<i32>} : memref<32x128xf32, #tpu.memory_space<vmem>>, vector<32x128xf32>,
    return
  }
  func.func @transform_0(%arg0: i32) -> (i32, i32) {
    %c0_i32 = arith.constant 0 : i32
    %c0_i32_0 = arith.constant 0 : i32
    %c0_i32_1 = arith.constant 0 : i32
    return %c0_i32, %c0_i32_0 : i32, i32
  }
  func.func @transform_1(%arg0: i32) -> (i32, i32) {
    %c0_i32 = arith.constant 0 : i32
    %c0_i32_0 = arith.constant 0 : i32
    %c0_i32_1 = arith.constant 0 : i32
    return %c0_i32, %c0_i32_0 : i32, i32
  }
  func.func @transform_2(%arg0: i32) -> (i32, i32) {
    %c0_i32 = arith.constant 0 : i32
    %c0_i32_0 = arith.constant 0 : i32
    %c0_i32_1 = arith.constant 0 : i32
    return %c0_i32, %c0_i32_0 : i32, i32
  }
  func.func @transform_3(%arg0: i32) -> (i32, i32) {
    %c0_i32 = arith.constant 0 : i32
    %c0_i32_0 = arith.constant 0 : i32
    %c0_i32_1 = arith.constant 0 : i32
    return %c0_i32, %c0_i32_0 : i32, i32
  }
  func.func @transform_4(%arg0: i32) -> (i32, i32) {
    %c0_i32 = arith.constant 0 : i32
    %c0_i32_0 = arith.constant 0 : i32
    %c0_i32_1 = arith.constant 0 : i32
    return %c0_i32, %c0_i32_0 : i32, i32
  }
  func.func @transform_5(%arg0: i32) -> (i32, i32) {
    %c0_i32 = arith.constant 0 : i32
    %c0_i32_0 = arith.constant 0 : i32
    %c0_i32_1 = arith.constant 0 : i32
    return %c0_i32, %c0_i32_0 : i32, i32
  }
  func.func @transform_6(%arg0: i32) -> (i32, i32) {
    %c0_i32 = arith.constant 0 : i32
    %c0_i32_0 = arith.constant 0 : i32
    %c0_i32_1 = arith.constant 0 : i32
    return %c0_i32, %c0_i32_0 : i32, i32
  }
}

</mosaic_0001>

<bundles_post_ra>
// kernel: decoder_block_forward.1
= control target key start
LH: loop header
LB: loop body
LE: loop exit
PB: predicated region body
PF: predicated region fallthrough
CT: control target
= control target key end

     0   :  { %v787_v2 = vmov 0.0|0.0   ;;  %s788_s25 = smov 72   ;;  %s789_s14 = smov 16   ;;  %v790_v54 = vmov 0.0   ;;  %vm48_vm0 = vcmask 130048   ;;  %vm104_vm1 = vcmask 719872   ;;  %s1101_s0 = inlined_call_operand.vmem [shape: f32[36,72], index: 0, kind: input, shape index: {}]   ;;  %s1102_s1 = inlined_call_operand.vmem [shape: f32[216,128], index: 1, kind: input, shape index: {}]   ;;  %s1103_s2 = inlined_call_operand.vmem [shape: f32[128,8], index: 2, kind: input, shape index: {}]   ;;  %s1104_s3 = inlined_call_operand.vmem [shape: f32[8,128], index: 3, kind: input, shape index: {}]   ;;  %s1105_s4 = inlined_call_operand.vmem [shape: f32[1,8], index: 4, kind: input, shape index: {}]   ;;  %s1106_s5 = inlined_call_operand.vmem [shape: f32[1,8], index: 5, kind: input, shape index: {}]   ;;  %s1107_s6 = inlined_call_operand.vmem [shape: f32[32,128], index: 6, kind: output, shape index: {}]  }
   0x1   :  { %v26_v0 = vld [vmem:[%s1101_s0 + $0x9] sm:$0xff]  ;;  %v25_v1 = vld [vmem:[%s1101_s0 + $0x1] sm:$0xff]  ;;  %693 = vmatprep.subr.bf16.mxu0 %v787_v2  ;;  %732 = vmatprep.subr.bf16.mxu1 %v787_v2  ;;  %v80_v9 = vld [vmem:[%s1102_s1 + $0x18] sm:$0xff]  ;;  %vm45_vm2 = vcmask 588800   ;;  %vm791_vm3 = vmmov 0   ;;  %vm394_vm4 = vcmask 64512  }
   0x2   :  { %33 = vrot.lane.b32.xlu1 %v26_v0, %s788_s25  ;;  %31 = vrot.lane.b32.xlu0 %v25_v1, %s788_s25  ;;  %v28_v3 = vld [vmem:[%s1101_s0 + $0xa] sm:$0xff]  ;;  %v27_v4 = vld [vmem:[%s1101_s0 + $0x2] sm:$0xff] }
   0x3   :  { %v77_v5 = vld [vmem:[%s1102_s1] sm:$0xff]  ;;  %v78_v6 = vld [vmem:[%s1102_s1 + $0x8] sm:$0xff]  ;;  %v79_v7 = vld [vmem:[%s1102_s1 + $0x10] sm:$0xff]  ;;  %645 = vmatprep.mubr.msk.f32.mxu1 %vm791_vm3, %v790_v54 }
   0x4   :  { %v694_v8 = vpack.c.bf16 %v78_v6, %v77_v5  ;;  %v55_v10 = vld [vmem:[%s1101_s0 + $0x14] sm:$0xff]  ;;  %v697_v12 = vpack.c.bf16 %v80_v9, %v79_v7  ;;  %v81_v13 = vld [vmem:[%s1102_s1 + $0x20] sm:$0xff]  ;;  %v82_v14 = vld [vmem:[%s1102_s1 + $0x28] sm:$0xff] }
   0x5   :  { %v53_v11 = vld [vmem:[%s1101_s0 + $0x13] sm:$0xff]  ;;  %v56_v15 = vld [vmem:[%s1101_s0 + $0x1c] sm:$0xff]  ;;  %v700_v17 = vpack.c.bf16 %v82_v14, %v81_v13  ;;  %v225_v23 = vld [vmem:[%s1103_s2 + $0x8] sm:$0xff] }
   0x6   :  { %41 = vrot.lane.b32.xlu1 %v28_v3, %s789_s14  ;;  %39 = vrot.lane.b32.xlu0 %v27_v4, %s789_s14  ;;  %v54_v16 = vld [vmem:[%s1101_s0 + $0x1b] sm:$0xff]  ;;  %v83_v18 = vld [vmem:[%s1102_s1 + $0x30] sm:$0xff] }
   0x7   :  { %695 = vmatpush1.bf16.msra.mxu0 %v694_v8  ;;  %v84_v19 = vld [vmem:[%s1102_s1 + $0x38] sm:$0xff]  ;;  %v85_v21 = vld [vmem:[%s1102_s1 + $0x40] sm:$0xff]  ;;  %v86_v24 = vld [vmem:[%s1102_s1 + $0x48] sm:$0xff] }
   0x8   :  { %696 = vmatprep.subr.bf16.mxu0 %v787_v2  ;;  %v703_v20 = vpack.c.bf16 %v84_v19, %v83_v18  ;;  %v224_v22 = vld [vmem:[%s1103_s2] sm:$0xff]  ;;  %v226_v26 = vld [vmem:[%s1103_s2 + $0x10] sm:$0xff]  ;;  %v227_v27 = vld [vmem:[%s1103_s2 + $0x18] sm:$0xff]  ;;  %v706_v29 = vpack.c.bf16 %v86_v24, %v85_v21 }
   0x9   :  { %v896_v25 = vpack.c.bf16 %v225_v23, %v224_v22  ;;  %v905_v28 = vpack.c.bf16 %v227_v27, %v226_v26  ;;  %v87_v30 = vld [vmem:[%s1102_s1 + $0x50] sm:$0xff]  ;;  %v88_v31 = vld [vmem:[%s1102_s1 + $0x58] sm:$0xff]  ;;  %v89_v33 = vld [vmem:[%s1102_s1 + $0x60] sm:$0xff] }
   0xa   :  { %67 = vrot.lane.b32.xlu1 %v55_v10, %s789_s14  ;;  %59 = vrot.lane.b32.xlu0 %v53_v11, %s788_s25  ;;  %v709_v32 = vpack.c.bf16 %v88_v31, %v87_v30  ;;  %v90_v34 = vld [vmem:[%s1102_s1 + $0x68] sm:$0xff]  ;;  %v91_v36 = vld [vmem:[%s1102_s1 + $0x70] sm:$0xff] }
   0xb   :  { %698 = vmatpush1.bf16.msra.mxu0 %v697_v12  ;;  %734 = vmatpush3.bf16.msra.mxu1 %v896_v25  ;;  %v712_v35 = vpack.c.bf16 %v90_v34, %v89_v33  ;;  %v92_v37 = vld [vmem:[%s1102_s1 + $0x78] sm:$0xff]  ;;  %v93_v39 = vld [vmem:[%s1102_s1 + $0x80] sm:$0xff]  ;;  %v94_v40 = vld [vmem:[%s1102_s1 + $0x88] sm:$0xff] }
   0xc   :  { %699 = vmatprep.subr.bf16.mxu0 %v787_v2  ;;  %735 = vmatprep.subr.bf16.mxu1 %v787_v2  ;;  %v715_v38 = vpack.c.bf16 %v92_v37, %v91_v36  ;;  %v718_v41 = vpack.c.bf16 %v94_v40, %v93_v39  ;;  %v95_v42 = vld [vmem:[%s1102_s1 + $0x90] sm:$0xff]  ;;  %v96_v43 = vld [vmem:[%s1102_s1 + $0x98] sm:$0xff]  ;;  %v97_v45 = vld [vmem:[%s1102_s1 + $0xa0] sm:$0xff] }
   0xd   :  { %v721_v44 = vpack.c.bf16 %v96_v43, %v95_v42  ;;  %v98_v46 = vld [vmem:[%s1102_s1 + $0xa8] sm:$0xff]  ;;  %v99_v48 = vld [vmem:[%s1102_s1 + $0xb0] sm:$0xff]  ;;  %v100_v49 = vld [vmem:[%s1102_s1 + $0xb8] sm:$0xff] }
   0xe   :  { %69 = vrot.lane.b32.xlu1 %v56_v15, %s789_s14  ;;  %61 = vrot.lane.b32.xlu0 %v54_v16, %s788_s25  ;;  %v724_v47 = vpack.c.bf16 %v98_v46, %v97_v45  ;;  %v727_v50 = vpack.c.bf16 %v100_v49, %v99_v48  ;;  %v101_v51 = vld [vmem:[%s1102_s1 + $0xc0] sm:$0xff]  ;;  %v102_v52 = vld [vmem:[%s1102_s1 + $0xc8] sm:$0xff] }
   0xf   :  { %701 = vmatpush1.bf16.msra.mxu0 %v700_v17  ;;  %737 = vmatpush3.bf16.msra.mxu1 %v905_v28  ;;  %v730_v53 = vpack.c.bf16 %v102_v52, %v101_v51  ;;  %v103_v55 = vld [vmem:[%s1102_s1 + $0xd0] sm:$0xff]  ;;  %v23_v58 = vld [vmem:[%s1101_s0] sm:$0xff]  ;;  %v24_v0 = vld [vmem:[%s1101_s0 + $0x8] sm:$0xff] }
  0x10   :  { %702 = vmatprep.subr.bf16.mxu0 %v787_v2  ;;  %738 = vmatprep.subr.bf16.mxu1 %v787_v2  ;;  %v51_v5 = vld [vmem:[%s1101_s0 + $0x12] sm:$0xff]  ;;  %v52_v11 = vld [vmem:[%s1101_s0 + $0x1a] sm:$0xff]  ;;  %v229_v14 = vld [vmem:[%s1103_s2 + $0x28] sm:$0xff] }
  0x11   :  { %v228_v13 = vld [vmem:[%s1103_s2 + $0x20] sm:$0xff]  ;;  %v230_v16 = vld [vmem:[%s1103_s2 + $0x30] sm:$0xff]  ;;  %v231_v17 = vld [vmem:[%s1103_s2 + $0x38] sm:$0xff] }
  0x12   :  { %v739_v15 = vpack.c.bf16 %v229_v14, %v228_v13  ;;  %v742_v18 = vpack.c.bf16 %v231_v17, %v230_v16  ;;  %v232_v19 = vld [vmem:[%s1103_s2 + $0x40] sm:$0xff]  ;;  %v234_v22 = vld [vmem:[%s1103_s2 + $0x50] sm:$0xff]  ;;  %v235_v23 = vld [vmem:[%s1103_s2 + $0x58] sm:$0xff]  ;;  %v541_v14 = vlaneseq }
  0x13   :  { %704 = vmatpush1.bf16.msra.mxu0 %v703_v20  ;;  %v233_v20 = vld [vmem:[%s1103_s2 + $0x48] sm:$0xff]  ;;  %v748_v24 = vpack.c.bf16 %v235_v23, %v234_v22  ;;  %v236_v26 = vld [vmem:[%s1103_s2 + $0x60] sm:$0xff]  ;;  %v238_v30 = vld [vmem:[%s1103_s2 + $0x70] sm:$0xff] }
  0x14   :  { %705 = vmatprep.subr.bf16.mxu0 %v787_v2  ;;  %740 = vmatpush3.bf16.msra.mxu1 %v739_v15  ;;  %v745_v21 = vpack.c.bf16 %v233_v20, %v232_v19  ;;  %v237_v27 = vld [vmem:[%s1103_s2 + $0x68] sm:$0xff]  ;;  %v239_v31 = vld [vmem:[%s1103_s2 + $0x78] sm:$0xff] }
  0x15   :  { %741 = vmatprep.subr.bf16.mxu1 %v787_v2 }
  0x17   :  { %707 = vmatpush1.bf16.msra.mxu0 %v706_v29  ;;  %v751_v29 = vpack.c.bf16 %v237_v27, %v236_v26 }
  0x18   :  { %708 = vmatprep.subr.bf16.mxu0 %v787_v2  ;;  %743 = vmatpush3.bf16.msra.mxu1 %v742_v18 }
  0x19   :  { %744 = vmatprep.subr.bf16.mxu1 %v787_v2 }
  0x1b   :  { %710 = vmatpush1.bf16.msra.mxu0 %v709_v32  ;;  %v754_v32 = vpack.c.bf16 %v239_v31, %v238_v30 }
  0x1c   :  { %711 = vmatprep.subr.bf16.mxu0 %v787_v2  ;;  %746 = vmatpush3.bf16.msra.mxu1 %v745_v21 }
  0x1d   :  { %747 = vmatprep.subr.bf16.mxu1 %v787_v2 }
  0x1f   :  { %713 = vmatpush1.bf16.msra.mxu0 %v712_v35 }
  0x20   :  { %714 = vmatprep.subr.bf16.mxu0 %v787_v2  ;;  %749 = vmatpush3.bf16.msra.mxu1 %v748_v24 }
  0x21   :  { %750 = vmatprep.subr.bf16.mxu1 %v787_v2 }
  0x23   :  { %716 = vmatpush1.bf16.msra.mxu0 %v715_v38 }
  0x24   :  { %717 = vmatprep.subr.bf16.mxu0 %v787_v2  ;;  %752 = vmatpush3.bf16.msra.mxu1 %v751_v29 }
  0x25   :  { %753 = vmatprep.subr.bf16.mxu1 %v787_v2 }
  0x27   :  { %719 = vmatpush1.bf16.msra.mxu0 %v718_v41 }
  0x28   :  { %720 = vmatprep.subr.bf16.mxu0 %v787_v2  ;;  %755 = vmatpush3.bf16.msra.mxu1 %v754_v32 }
  0x29   :  { %756 = vmatprep.subr.bf16.mxu1 %v787_v2 }
  0x2b   :  { %722 = vmatpush1.bf16.msra.mxu0 %v721_v44 }
  0x2c   :  { %723 = vmatprep.subr.bf16.mxu0 %v787_v2 }
  0x2f   :  { %725 = vmatpush1.bf16.msra.mxu0 %v724_v47 }
  0x30   :  { %726 = vmatprep.subr.bf16.mxu0 %v787_v2 }
  0x33   :  { %728 = vmatpush1.bf16.msra.mxu0 %v727_v50 }
  0x34   :  { %729 = vmatprep.subr.bf16.mxu0 %v787_v2 }
  0x37   :  { %731 = vmatpush1.bf16.msra.mxu0 %v730_v53 }
  0x38   :  { %169 = vmatprep.subr.mxu0 %v790_v54 }
  0x3b   :  { %170 = vmatpush1.msra.mxu0 %v103_v55 }
  0x3c   :  { %688 = vmatprep.subr.mxu0 %v790_v54 }
  0x74   :  { %v34_v56 = vpop.permute.xlu1 %33  ;;  %v32_v57 = vpop.permute.xlu0 %31 }
  0x75   :  { %v46_v62 = vsel %vm45_vm2, %v23_v58, %v32_v57  ;;  %v47_v6 = vsel %vm45_vm2, %v24_v0, %v34_v56 }
  0x78   :  { %v42_v59 = vpop.permute.xlu1 %41  ;;  %v40_v60 = vpop.permute.xlu0 %39 }
  0x79   :  { %v49_v61 = vsel %vm48_vm0, %v32_v57, %v40_v60  ;;  %v50_v63 = vsel %vm48_vm0, %v34_v56, %v42_v59 }
  0x7a   :  { %569 = vmatprep.mubr.msk.f32.mxu0 %vm104_vm1, %v49_v61 }
  0x7b   :  { %182 = vmatmul.mubr.f32.vlgmr.msra.gmra.mrb[0].mxu0 %v46_v62  ;;  %v393_v62 = vld [vmem:[%s1104_s3] sm:$0xff] }
  0x7c   :  { %570 = vmatprep.mubr.msk.f32.mxu0 %vm104_vm1, %v50_v63  ;;  %v68_v1 = vpop.permute.xlu1 %67  ;;  %v60_v3 = vpop.permute.xlu0 %59  ;;  %689 = vmatpush3.msra.mxu0 %v393_v62 }
  0x7d   :  { %v75_v4 = vsel %vm48_vm0, %v60_v3, %v68_v1  ;;  %v73_v7 = vsel %vm45_vm2, %v51_v5, %v60_v3 }
  0x7f   :  { %187 = vmatmul.mubr.f32.gmra.mrb[2].mxu0 %v47_v6 }
  0x80   :  { %571 = vmatprep.mubr.msk.f32.mxu0 %vm104_vm1, %v75_v4  ;;  %v70_v8 = vpop.permute.xlu1 %69  ;;  %v62_v9 = vpop.permute.xlu0 %61 }
  0x81   :  { %v76_v10 = vsel %vm48_vm0, %v62_v9, %v70_v8  ;;  %v74_v12 = vsel %vm45_vm2, %v52_v11, %v62_v9  ;;  %v390_v11 = vld [vmem:[%s1106_s5] sm:$0x1] }
  0x83   :  { %192 = vmatmul.mubr.f32.gmra.mrb[4].mxu0 %v73_v7 }
  0x84   :  { %572 = vmatprep.mubr.msk.f32.mxu0 %vm104_vm1, %v76_v10 }
  0x87   :  { %197 = vmatmul.mubr.f32.gmra.mrb[6].mxu0 %v74_v12 }
  0x88   :  { %690 = vmatprep.mubr.msk.f32.mxu0 %vm791_vm3, %v790_v54 }
 0x14e   :  { %v1042_v33 = vpop.f32.mrb[0].mxu0 }
 0x14f   :  { %v185_v34 = vpop.f32.mrb[1].mxu0  ;;  %v211_v36 = vmul.f32 %v1042_v33, %v1042_v33 }
 0x152   :  { %v1044_v35 = vpop.f32.mrb[2].mxu0 }
 0x153   :  { %v202_v37 = vadd.f32 %v1044_v35, %v1042_v33  ;;  %v212_v38 = vmul.f32 %v1044_v35, %v1044_v35  ;;  %v190_v39 = vpop.f32.mrb[3].mxu0 }
 0x155   :  { %v215_v40 = vadd.f32 %v212_v38, %v211_v36 }
 0x156   :  { %v1052_v41 = vpop.f32.mrb[4].mxu0 }
 0x157   :  { %v203_v42 = vadd.f32 %v202_v37, %v1052_v41  ;;  %v213_v43 = vmul.f32 %v1052_v41, %v1052_v41  ;;  %v195_v44 = vpop.f32.mrb[5].mxu0 }
 0x159   :  { %v216_v45 = vadd.f32 %v215_v40, %v213_v43 }
 0x15a   :  { %v1057_v46 = vpop.f32.mrb[6].mxu0 }
 0x15b   :  { %v204_v47 = vadd.f32 %v203_v42, %v1057_v46  ;;  %v214_v48 = vmul.f32 %v1057_v46, %v1057_v46  ;;  %v200_v49 = vpop.f32.mrb[7].mxu0 }
 0x15d   :  { %v205_v50 = vrot.slane %v204_v47, 4  ;;  %v217_v51 = vadd.f32 %v216_v45, %v214_v48 }
 0x15f   :  { %v206_v52 = vadd.f32 %v205_v50, %v204_v47  ;;  %v218_v58 = vrot.slane %v217_v51, 4 }
 0x161   :  { %v207_v53 = vrot.slane %v206_v52, 2  ;;  %v219_v59 = vadd.f32 %v218_v58, %v217_v51 }
 0x163   :  { %v208_v55 = vadd.f32 %v207_v53, %v206_v52  ;;  %v220_v60 = vrot.slane %v219_v59, 2 }
 0x165   :  { %v209_v56 = vrot.slane %v208_v55, 1 }
 0x167   :  { %v210_v57 = vadd.f32 %v209_v56, %v208_v55 }
 0x169   :  { %646 = vmatmul.mubr.f32.vlgmr.msra.gmra.mrb[0].mxu1 %v210_v57 }
 0x16a   :  { %758 = vmatpush3.bf16.msra.mxu1 %v896_v25  ;;  %680 = vmatprep.mubr.msk.f32.mxu1 %vm791_vm3, %v790_v54  ;;  %v221_v25 = vadd.f32 %v220_v60, %v219_v59 }
 0x16b   :  { %759 = vmatprep.subr.bf16.mxu1 %v787_v2 }
 0x16e   :  { %761 = vmatpush3.bf16.msra.mxu1 %v905_v28  ;;  %v222_v28 = vrot.slane %v221_v25, 1 }
 0x16f   :  { %762 = vmatprep.subr.bf16.mxu1 %v787_v2 }
 0x170   :  { %v223_v61 = vadd.f32 %v222_v28, %v221_v25 }
 0x172   :  { %764 = vmatpush3.bf16.msra.mxu1 %v739_v15  ;;  %v542_v15 = vshrl.u32 %v541_v14, 7 }
 0x173   :  { %765 = vmatprep.subr.bf16.mxu1 %v787_v2 }
 0x174   :  { %v543_v16 = vsub.s32 0, %v542_v15 }
 0x176   :  { %767 = vmatpush3.bf16.msra.mxu1 %v742_v18 }
 0x177   :  { %768 = vmatprep.subr.bf16.mxu1 %v787_v2 }
 0x17a   :  { %770 = vmatpush3.bf16.msra.mxu1 %v745_v21 }
 0x17b   :  { %771 = vmatprep.subr.bf16.mxu1 %v787_v2 }
 0x17e   :  { %773 = vmatpush3.bf16.msra.mxu1 %v748_v24 }
 0x17f   :  { %774 = vmatprep.subr.bf16.mxu1 %v787_v2 }
 0x182   :  { %776 = vmatpush3.bf16.msra.mxu1 %v751_v29 }
 0x183   :  { %777 = vmatprep.subr.bf16.mxu1 %v787_v2 }
 0x186   :  { %779 = vmatpush3.bf16.msra.mxu1 %v754_v32 }
 0x187   :  { %683 = vmatprep.subr.mxu1 %v790_v54 }
 0x189   :  { %681 = vmatmul.mubr.f32.vlgmr.msra.gmra.mrb[2].mxu1 %v223_v61 }
 0x18a   :  { %685 = vmatprep.mubr.msk.f32.mxu1 %vm791_vm3, %v790_v54  ;;  %684 = vmatpush3.msra.mxu1 %v393_v62  ;;  %v388_v54 = vld [vmem:[%s1105_s4] sm:$0x1] }
 0x23c   :  { %v306_v63 = vpop.f32.mrb[0].mxu1 }
 0x23d   :  { %v647_v0 = vpop.f32.mrb[1].mxu1  ;;  %v381_v1 = vmul.f32 0.001953125, %v306_v63 }
 0x23f   :  { %v383_v2 = vmul.f32 %v381_v1, %v381_v1 }
 0x25c   :  { %v376_v3 = vpop.f32.mrb[2].mxu1 }
 0x25d   :  { %v382_v4 = vmul.f32 0.001953125, %v376_v3  ;;  %v682_v5 = vpop.f32.mrb[3].mxu1 }
 0x25f   :  { %v384_v6 = vsub.f32 %v382_v4, %v383_v2 }
 0x261   :  { %v385_v7 = vmax.f32 %v384_v6, 0.0 }
 0x263   :  { %v386_v8 = vadd.f32 1e-05, %v385_v7 }
 0x265   :  { %785 = vrsqrt.f32 %v386_v8 }
 0x26f   :  { %v786_v9 = vpop.eup %785 }
 0x270   :  { %v389_v10 = vmul.f32 %v786_v9, %v388_v54 }
 0x272   :  { %v391_v12 = vmul.f32 %v389_v10, %v381_v1  ;;  %686 = vmatmul.mubr.msk.f32.vlgmr.msra.gmra.mrb[4].mxu1 %vm394_vm4, %v389_v10 }
 0x274   :  { %v392_v13 = vsub.f32 %v390_v11, %v391_v12 }
 0x276   :  { %691 = vmatmul.mubr.msk.f32.vlgmr.msra.gmra.mrb[8].mxu0 %vm394_vm4, %v392_v13 }
 0x345   :  { %v464_v17 = vpop.f32.mrb[4].mxu1 }
 0x346   :  { %v544_v18 = vrot.slane %v464_v17, %v543_v16  ;;  %v687_v19 = vpop.f32.mrb[5].mxu1 }
 0x348   :  { %v545_v20 = vmul.f32 %v544_v18, %v1042_v33  ;;  %v546_v21 = vmul.f32 %v544_v18, %v1044_v35  ;;  %v547_v22 = vmul.f32 %v544_v18, %v1052_v41  ;;  %v548_v23 = vmul.f32 %v544_v18, %v1057_v46 }
 0x349   :  { %v537_v24 = vpop.f32.mrb[8].mxu0 }
 0x34a   :  { %v552_v26 = vrot.slane %v537_v24, %v543_v16  ;;  %v692_v27 = vpop.f32.mrb[9].mxu0 }
 0x34c   :  { %v553_v29 = vadd.f32 %v552_v26, %v545_v20  ;;  %v554_v30 = vadd.f32 %v552_v26, %v546_v21  ;;  %v555_v31 = vadd.f32 %v552_v26, %v547_v22  ;;  %v556_v32 = vadd.f32 %v552_v26, %v548_v23 }
 0x34e   :  { %v557_v34 = vmax.f32 %v553_v29, 0.0  ;;  %v558_v36 = vmax.f32 %v554_v30, 0.0  ;;  %v559_v37 = vmax.f32 %v555_v31, 0.0  ;;  %v560_v38 = vmax.f32 %v556_v32, 0.0 }
 0x350   :  { %561 = vst [vmem:[%s1107_s6] sm:$0xff] %v557_v34  ;;  %562 = vst [vmem:[%s1107_s6 + $0x8] sm:$0xff] %v558_v36 }
 0x351   :  { %563 = vst [vmem:[%s1107_s6 + $0x10] sm:$0xff] %v559_v37  ;;  %564 = vst [vmem:[%s1107_s6 + $0x18] sm:$0xff] %v560_v38 }

</bundles_post_ra>
